<compile_context>
chip_gen: v7x
topology: tpu7x:2x2x1
jax: 0.10.0
libtpu: 0.0.40
codegen_flags: <defaults>
</compile_context>

<pallas_src>
import jax
import jax.numpy as jnp
from jax import lax
from jax.experimental import pallas as pl
from jax.experimental.pallas import tpu as pltpu

_LANE = 128  # TPU lane width (last vreg dim)


def _channel_affine_kernel(x_ref, scale_ref, shift_ref, o_ref):
    """x_ref / o_ref : (row_block, hw_p) VMEM tile of the (N*C, H*W) slab.
       scale_ref / shift_ref : (row_block, 1) per-block param columns
       (broadcast along the lane axis).  One FMA per vreg."""
    o_ref[...] = x_ref[...] * scale_ref[...] + shift_ref[...]


def _round_down_mult(x, m):
    return (x // m) * m


def _round_up_mult(x, m):
    return -(-x // m) * m


def _channel_affine(x2d, scale_rows, shift_rows, *, row_block, vmem_limit_bytes):
    rows, hw_p = x2d.shape
    grid = (pl.cdiv(rows, row_block),)
    return pl.pallas_call(
        _channel_affine_kernel,
        out_shape=jax.ShapeDtypeStruct((rows, hw_p), x2d.dtype),
        grid=grid,
        in_specs=[
            pl.BlockSpec((row_block, hw_p), lambda i: (i, 0)),
            pl.BlockSpec((row_block, 1), lambda i: (i, 0)),   # per-block params
            pl.BlockSpec((row_block, 1), lambda i: (i, 0)),   # per-block params
        ],
        out_specs=pl.BlockSpec((row_block, hw_p), lambda i: (i, 0)),
        input_output_aliases={0: 0},   # write in place over the x slab
        compiler_params=pltpu.CompilerParams(
            dimension_semantics=("parallel",),
            vmem_limit_bytes=vmem_limit_bytes,
        ),
    )(x2d, scale_rows, shift_rows)


def prob_transform(x_nchw, scale_c, shift_c, p, key):
    """Pallas implementation of ProbTransform(f, p) with f = per-channel affine.

    x_nchw : (N, C, H, W)
    scale_c, shift_c : (C,) parameters of f
    p      : probability of applying f
    key    : jax PRNG key (replaces python `random.random()`)
    """
    N, C, H, W = x_nchw.shape
    rows, hw = N * C, H * W
    dtype = x_nchw.dtype
    itemsize = jnp.dtype(dtype).itemsize

    # Sublane packing granularity: 8 rows for 32-bit, 16 for bf16, 32 for int8/fp8.
    sub = max(8, 32 // itemsize)

    # Lane-dense output: pad H*W up to a multiple of 128 (sliced off afterwards).
    hw_p = _round_up_mult(hw, _LANE)

    # VMEM bytes per row per pipeline buffer:
    #   x tile + out tile + two (row_block, 1) param columns lane-padded to 128.
    per_row_vmem = (2 * hw_p + 2 * _LANE) * itemsize
    buf_count = 2                                   # double buffering
    pipeline_budget = 32 * 1024 * 1024              # fits v7x 64 MiB with headroom
    row_block = max(sub, _round_down_mult(pipeline_budget // (buf_count * per_row_vmem), sub))

    if row_block >= rows:
        if rows >= 2 * sub:
            # Whole slab fits one block: split into 2 grid steps so v7x's two
            # TensorCores both get work (harmless on single-TC v5e/v6e).
            row_block = min(rows, _round_up_mult(-(-rows // 2), sub))
        else:
            row_block = rows                        # single full-extent block
    grid_rows = pl.cdiv(rows, row_block)
    rows_padded = grid_rows * row_block

    # Honest VMEM budget: pipelined x/out tiles + lane-padded param columns + slack.
    need = buf_count * row_block * per_row_vmem + 4 * 1024 * 1024
    vmem_limit_bytes = int(max(16 * 1024 * 1024, need))

    # --- glue: (N, C, H, W) -> (N*C, H*W) slab, lane-padded if needed ---
    x2d = x_nchw.reshape(rows, hw)
    if hw_p != hw:
        x2d = jnp.pad(x2d, ((0, 0), (0, hw_p - hw)))
    scale_rows = jnp.tile(scale_c.astype(dtype), N)     # row r -> channel r % C
    shift_rows = jnp.tile(shift_c.astype(dtype), N)
    if rows_padded > rows:
        pad = rows_padded - rows
        scale_rows = jnp.pad(scale_rows, (0, pad), constant_values=1)
        shift_rows = jnp.pad(shift_rows, (0, pad), constant_values=0)
    scale_rows = scale_rows.reshape(rows_padded, 1)
    shift_rows = shift_rows.reshape(rows_padded, 1)

    # --- Bernoulli gate (mirrors `random.random() < p`), hoisted around the kernel ---
    u = jax.random.uniform(key, (), dtype=jnp.float32)
    apply_f = u < jnp.asarray(p, dtype=jnp.float32)

    out2d = lax.cond(
        apply_f,
        lambda ops: _channel_affine(ops[0], ops[1], ops[2],
                                    row_block=row_block,
                                    vmem_limit_bytes=vmem_limit_bytes),
        lambda ops: ops[0],                         # identity: no kernel launch
        (x2d, scale_rows, shift_rows),
    )
    if hw_p != hw:
        out2d = out2d[:, :hw]
    return out2d.reshape(N, C, H, W)


if __name__ == "__main__":
    # Small shapes consistent with an NCHW image transform.
    N, C, H, W = 2, 4, 16, 16
    p = 0.7

    key = jax.random.PRNGKey(0)
    k_x, k_gate = jax.random.split(key, 2)

    x = jax.random.normal(k_x, (N, C, H, W), dtype=jnp.float32)

    # Deterministic parameters of the wrapped transform f (per-channel affine).
    scale = 1.0 + 0.1 * jnp.arange(C, dtype=jnp.float32)
    shift = 0.01 * jnp.arange(C, dtype=jnp.float32)
    # TODO(synk): original `f` is an arbitrary nn.Module; instantiated here as a
    # deterministic per-channel affine since no concrete f is specified.

    run = jax.jit(prob_transform)
    out = jax.block_until_ready(run(x, scale, shift, p, k_gate))

    # Reference check in plain JAX (same gate draw).
    u = jax.random.uniform(k_gate, (), dtype=jnp.float32)
    y_f = x * scale.reshape(1, C, 1, 1) + shift.reshape(1, C, 1, 1)
    ref = jnp.where(u < p, y_f, x)
    assert out.shape == (N, C, H, W)
    assert jnp.allclose(out, ref, atol=1e-6), "mismatch vs reference"

    print("KERNEL_OK")
</pallas_src>

<mosaic_0001>
module attributes {stable_mosaic.version = 11 : i64} {
  func.func @_channel_affine_kernel(%arg0: i32, %arg1: memref<8x256xf32, #tpu.memory_space<vmem>>, %arg2: memref<8x1xf32, #tpu.memory_space<vmem>>, %arg3: memref<8x1xf32, #tpu.memory_space<vmem>>, %arg4: memref<8x256xf32, #tpu.memory_space<vmem>>) attributes {dimension_semantics = [#tpu.dimension_semantics<parallel>], iteration_bounds = array<i64: 1>, scalar_prefetch = 0 : i64, scratch_operands = 0 : i64, tpu.core_type = #tpu.core_type<tc>, window_params = [{transform_indices = @transform_0, window_bounds = array<i64: 8, 256>}, {transform_indices = @transform_1, window_bounds = array<i64: 8, 1>}, {transform_indices = @transform_2, window_bounds = array<i64: 8, 1>}, {transform_indices = @transform_3, window_bounds = array<i64: 8, 256>}]} {
    %c0 = arith.constant 0 : index
    %c0_0 = arith.constant 0 : index
    %0 = vector.load %arg1[%c0, %c0_0] : memref<8x256xf32, #tpu.memory_space<vmem>>, vector<8x256xf32>
    %c0_1 = arith.constant 0 : index
    %c0_2 = arith.constant 0 : index
    %1 = vector.load %arg2[%c0_1, %c0_2] : memref<8x1xf32, #tpu.memory_space<vmem>>, vector<8x1xf32>
    %2 = vector.broadcast %1 : vector<8x1xf32> to vector<8x256xf32>
    %3 = arith.mulf %0, %2 : vector<8x256xf32>
    %c0_3 = arith.constant 0 : index
    %c0_4 = arith.constant 0 : index
    %4 = vector.load %arg3[%c0_3, %c0_4] : memref<8x1xf32, #tpu.memory_space<vmem>>, vector<8x1xf32>
    %5 = vector.broadcast %4 : vector<8x1xf32> to vector<8x256xf32>
    %6 = arith.addf %3, %5 : vector<8x256xf32>
    %c0_5 = arith.constant 0 : index
    %c0_6 = arith.constant 0 : index
    %7 = vector.load %arg4[%c0_5, %c0_6] : memref<8x256xf32, #tpu.memory_space<vmem>>, vector<8x256xf32>
    tpu.vector_store %arg4[%c0_5, %c0_6], %6 {strides = array<i32>} : memref<8x256xf32, #tpu.memory_space<vmem>>, vector<8x256xf32>,
    return
  }
  func.func @transform_0(%arg0: i32) -> (i32, i32) {
    %c0_i32 = arith.constant 0 : i32
    %c0_i32_0 = arith.constant 0 : i32
    return %arg0, %c0_i32 : i32, i32
  }
  func.func @transform_1(%arg0: i32) -> (i32, i32) {
    %c0_i32 = arith.constant 0 : i32
    %c0_i32_0 = arith.constant 0 : i32
    return %arg0, %c0_i32 : i32, i32
  }
  func.func @transform_2(%arg0: i32) -> (i32, i32) {
    %c0_i32 = arith.constant 0 : i32
    %c0_i32_0 = arith.constant 0 : i32
    return %arg0, %c0_i32 : i32, i32
  }
  func.func @transform_3(%arg0: i32) -> (i32, i32) {
    %c0_i32 = arith.constant 0 : i32
    %c0_i32_0 = arith.constant 0 : i32
    return %arg0, %c0_i32 : i32, i32
  }
}

</mosaic_0001>

<bundles_post_ra>
// kernel: tile.3
= control target key start
LH: loop header
LB: loop body
LE: loop exit
PB: predicated region body
PF: predicated region fallthrough
CT: control target
= control target key end

     0   :  { %s22_s0 = inlined_call_operand.vmem [shape: f32[4], index: 0, kind: input, shape index: {}]   ;;  %s23_s1 = inlined_call_operand.vmem [shape: f32[2,4], index: 1, kind: output, shape index: {}]  }
   0x1   :  { %v4_v0 = vld [vmem:[%s22_s0] ss:$0 sm:$0xff] }
   0x2   :  { %5 = vst [vmem:[%s23_s1] sm:$0x3] %v4_v0 }

// kernel: tile.4
= control target key start
LH: loop header
LB: loop body
LE: loop exit
PB: predicated region body
PF: predicated region fallthrough
CT: control target
= control target key end

     0   :  { %s34_s8 = smov 125   ;;  %vm7_vm0 = vcmask 7168   ;;  %s35_s11 = smov 126   ;;  %s61_s0 = inlined_call_operand.vmem [shape: f32[2,4], index: 0, kind: input, shape index: {}]   ;;  %s62_s1 = inlined_call_operand.vmem [shape: f32[8,1], index: 1, kind: output, shape index: {}]  }
   0x1   :  { %v4_v0 = vld [vmem:[%s61_s0] sm:$0x3]  ;;  %s33_s0 = smov 127  }
   0x2   :  { %5 = vst [vmem:[#allocation0] sm:$0x3] %v4_v0 }
   0x9   :  { %v9_v1 = vld [vmem:[#allocation0] sm:$0x3]  }
   0xa   :  { %v21_v2 = vld [vmem:[#allocation0] sm:$0x3]   ;;  %10 = vrot.lane.b32.xlu0 %v9_v1, %s33_s0 }
   0xb   :  { %22 = vrot.lane.b32.xlu1 %v21_v2, %s34_s8  ;;  %v6_v3 = vld [vmem:[#allocation0] sm:$0x3]  }
   0xc   :  { %v15_v4 = vld [vmem:[#allocation0] sm:$0x3]   ;;  %8 = vst.msk [vmem:[%s62_s1] ss:$4 sm:$0x3] %vm7_vm0, %v6_v3  }
   0xe   :  { %16 = vrot.lane.b32.xlu0 %v15_v4, %s35_s11 }
  0x7c   :  { %v11_v5 = vpop.permute.xlu0 %10  }
  0x7d   :  { %v23_v6 = vpop.permute.xlu1 %22   ;;  %27 = vst.msk [vmem:[%s62_s1 + $0x1] ss:$4 sm:$0x3] %vm7_vm0, %v11_v5  }
  0x7e   :  { %29 = vst.msk [vmem:[%s62_s1 + $0x3] ss:$4 sm:$0x3] %vm7_vm0, %v23_v6  }
  0x80   :  { %v17_v7 = vpop.permute.xlu0 %16  }
  0x81   :  { %28 = vst.msk [vmem:[%s62_s1 + $0x2] ss:$4 sm:$0x3] %vm7_vm0, %v17_v7  }

// kernel: branch_1_fun.1
= control target key start
LH: loop header
LB: loop body
LE: loop exit
PB: predicated region body
PF: predicated region fallthrough
CT: control target
= control target key end

     0   :  { %v40_v0 = vmov 0   ;;  %s79_s1 = inlined_call_operand.vmem [shape: f32[8,1], index: 1, kind: input, shape index: {}]   ;;  %s80_s2 = inlined_call_operand.vmem [shape: f32[8,1], index: 2, kind: input, shape index: {}]   ;;  %s81_s0 = inlined_call_operand.vmem [shape: f32[8,256], index: 0, kind: input, shape index: {}, may-alias: {0,3}]   ;;  %s82_s3 = inlined_call_operand.vmem [shape: f32[8,256], index: 3, kind: output, shape index: {}, may-alias: {0,3}]  }
   0x1   :  { %39 = vset.pattern.permute.xlu0 %v40_v0  ;;  %v16_v1 = vld [vmem:[%s79_s1] sm:$0xff]  ;;  %v15_v5 = vld [vmem:[%s81_s0 + $0x8] sm:$0xff] }
   0x2   :  { %19 = vperm.xlu0 %39, %v16_v1   ;;  %v24_v2 = vld [vmem:[%s80_s2] sm:$0xff] }
   0x3   :  { %v14_v4 = vld [vmem:[%s81_s0] sm:$0xff] }
   0x6   :  { %27 = vperm.xlu0 %39, %v24_v2  }
  0x81   :  { %v20_v3 = vpop.permute.xlu0 %19 }
  0x82   :  { %v22_v6 = vmul.f32 %v20_v3, %v14_v4  ;;  %v23_v7 = vmul.f32 %v20_v3, %v15_v5 }
  0x85   :  { %v28_v8 = vpop.permute.xlu0 %27 }
  0x86   :  { %v30_v9 = vadd.f32 %v28_v8, %v22_v6  ;;  %v31_v10 = vadd.f32 %v28_v8, %v23_v7 }
  0x88   :  { %32 = vst [vmem:[%s82_s3] sm:$0xff] %v30_v9  ;;  %33 = vst [vmem:[%s82_s3 + $0x8] sm:$0xff] %v31_v10 }

</bundles_post_ra>
